<compile_context>
chip_gen: v7x
topology: tpu7x:2x2x1
jax: 0.10.0
libtpu: 0.0.40
codegen_flags: <defaults>
</compile_context>

<pallas_src>
import functools

import jax
import jax.numpy as jnp
from jax import lax
from jax.experimental import pallas as pl
from jax.experimental.pallas import tpu as pltpu

TILE = 128   # tokens gathered per grid step (sublane/lane-dense output tile)
NBUF = 8     # outstanding row DMAs kept in flight (ring of DMA semaphores)


def _embed_gather_kernel(ids_ref, emb_hbm, out_ref, sem, *, vocab_size):
    """Gather TILE embedding rows per grid step via a ring of row DMAs.

    ids_ref : SMEM (N_pad,) int32  -- scalar-prefetched token ids
    emb_hbm : HBM  (V, D)          -- raw embedding table ref (pl.ANY)
    out_ref : VMEM (TILE, D)       -- output tile; DMA destination
    sem     : DMA semaphores (NBUF,)
    """
    base = pl.program_id(0) * TILE

    def start_row(j):
        tok = ids_ref[base + j]
        tok = jnp.clip(tok, 0, vocab_size - 1)   # OOB-safe gather
        pltpu.make_async_copy(
            emb_hbm.at[pl.ds(tok, 1), :],
            out_ref.at[pl.ds(j, 1), :],
            sem.at[j % NBUF],
        ).start()

    def wait_row(j):
        # Same-shaped descriptor as the copy issued for token j on this slot.
        pltpu.make_async_copy(
            emb_hbm.at[pl.ds(0, 1), :],
            out_ref.at[pl.ds(j, 1), :],
            sem.at[j % NBUF],
        ).wait()

    # Prime the ring: NBUF row DMAs in flight.
    def prime(j, carry):
        start_row(j)
        return carry
    lax.fori_loop(0, NBUF, prime, 0, unroll=True)

    # Steady state: retire the copy that used this slot NBUF tokens ago,
    # then issue the next one -- keeps exactly NBUF copies in flight.
    def steady(j, carry):
        wait_row(j - NBUF)
        start_row(j)
        return carry
    lax.fori_loop(NBUF, TILE, steady, 0)

    # Drain: wait for the last NBUF copies before the tile is written back.
    def drain(s, carry):
        wait_row(TILE - NBUF + s)
        return carry
    lax.fori_loop(0, NBUF, drain, 0, unroll=True)


def llama_input_embedding(input_ids, emb_table):
    """input_ids: (B, S) int; emb_table: (V, D) -> (B, S, D) in table dtype."""
    B, S = input_ids.shape
    V, D = emb_table.shape
    N = B * S
    n_pad = pl.cdiv(N, TILE) * TILE
    ids_flat = jnp.zeros((n_pad,), jnp.int32).at[:N].set(
        input_ids.reshape(N).astype(jnp.int32))
    # TODO(synk): for very long sequences (N >> 64k tokens) stage ids per-tile
    # via an SMEM-blocked input instead of one flat scalar-prefetch array
    # (1-D SMEM arrays pad to next_pow2(4N) bytes).

    grid_spec = pltpu.PrefetchScalarGridSpec(
        num_scalar_prefetch=1,
        grid=(n_pad // TILE,),
        # Embedding table stays in HBM; rows are DMA-gathered on demand.
        in_specs=[pl.BlockSpec(memory_space=pl.ANY)],
        out_specs=pl.BlockSpec((TILE, D), lambda i, ids: (i, 0)),
        scratch_shapes=[pltpu.SemaphoreType.DMA((NBUF,))],
    )

    out_flat = pl.pallas_call(
        functools.partial(_embed_gather_kernel, vocab_size=V),
        grid_spec=grid_spec,
        out_shape=jax.ShapeDtypeStruct((n_pad, D), emb_table.dtype),
        compiler_params=pltpu.CompilerParams(
            dimension_semantics=("parallel",)),
    )(ids_flat, emb_table)

    return out_flat[:N].reshape(B, S, D)


if __name__ == "__main__":
    # Small, deterministic synthetic setup (no checkpoint loading).
    vocab_size = 512
    embed_dim = 256          # lane-aligned
    batch = 2
    seq = 72                 # B*S = 144: not a multiple of TILE -> exercises
                             # the padding path and a 2-step grid.

    key = jax.random.PRNGKey(0)
    k_emb, k_ids = jax.random.split(key)

    emb_table = jax.random.normal(k_emb, (vocab_size, embed_dim), dtype=jnp.float32)
    input_ids = jax.random.randint(k_ids, (batch, seq), 0, vocab_size, dtype=jnp.int32)

    out = jax.block_until_ready(llama_input_embedding(input_ids, emb_table))

    # Reference check: nn.Embedding(ids) == table[ids]  (exact copy, no math)
    ref = jnp.take(emb_table, input_ids.reshape(-1), axis=0).reshape(
        batch, seq, embed_dim)
    assert out.shape == (batch, seq, embed_dim)
    assert out.dtype == jnp.float32
    assert jnp.array_equal(out, ref), "mismatch vs. reference gather"

    print("KERNEL_OK")
</pallas_src>

<mosaic_0001>
module attributes {stable_mosaic.version = 11 : i64} {
  func.func @_embed_gather_kernel(%arg0: i32, %arg1: memref<256xi32, #tpu.memory_space<smem>>, %arg2: memref<512x256xf32, #tpu.memory_space<any>>, %arg3: memref<128x256xf32, #tpu.memory_space<vmem>>, %arg4: memref<8x!tpu.dma_semaphore, #tpu.memory_space<semaphore_mem>>) attributes {dimension_semantics = [#tpu.dimension_semantics<parallel>], iteration_bounds = array<i64: 2>, scalar_prefetch = 1 : i64, scratch_operands = 1 : i64, tpu.core_type = #tpu.core_type<tc>, window_params = [{}, {transform_indices = @transform_1, window_bounds = array<i64: 128, 256>}]} {
    %c128_i32 = arith.constant 128 : i32
    %0 = arith.muli %arg0, %c128_i32 : i32
    %c0_i32 = arith.constant 0 : i32
    %1 = arith.addi %0, %c0_i32 : i32
    %2 = arith.index_cast %1 : i32 to index
    %3 = memref.load %arg1[%2] : memref<256xi32, #tpu.memory_space<smem>>
    %c0_i32_0 = arith.constant 0 : i32
    %c511_i32 = arith.constant 511 : i32
    %4 = arith.maxsi %c0_i32_0, %3 : i32
    %5 = arith.minsi %c511_i32, %4 : i32
    %c8_i32 = arith.constant 8 : i32
    %c0_i32_1 = arith.constant 0 : i32
    %6 = arith.cmpi eq, %c8_i32, %c0_i32_1 : i32
    %c1_i32 = arith.constant 1 : i32
    %7 = arith.select %6, %c1_i32, %c8_i32 : i32
    %8 = arith.remsi %c0_i32, %7 : i32
    %c0_i32_2 = arith.constant 0 : i32
    %9 = arith.cmpi ne, %8, %c0_i32_2 : i32
    %c0_i32_3 = arith.constant 0 : i32
    %10 = arith.cmpi slt, %8, %c0_i32_3 : i32
    %c0_i32_4 = arith.constant 0 : i32
    %11 = arith.cmpi slt, %7, %c0_i32_4 : i32
    %12 = arith.xori %10, %11 : i1
    %13 = arith.andi %12, %9 : i1
    %14 = arith.addi %8, %7 : i32
    %15 = arith.select %13, %14, %8 : i32
    %c0_i32_5 = arith.constant 0 : i32
    %16 = tpu.memref_slice %arg2[%5, %c0_i32_5] : memref<512x256xf32, #tpu.memory_space<any>> -> memref<1x256xf32, #tpu.memory_space<any>>
    %c0_i32_6 = arith.constant 0 : i32
    %17 = tpu.memref_slice %arg3[%c0_i32, %c0_i32_6] : memref<128x256xf32, #tpu.memory_space<vmem>> -> memref<1x256xf32, #tpu.memory_space<vmem>>
    %18 = tpu.memref_slice %arg4[%15] : memref<8x!tpu.dma_semaphore, #tpu.memory_space<semaphore_mem>> -> memref<1x!tpu.dma_semaphore, #tpu.memory_space<semaphore_mem>>
    %19 = tpu.memref_squeeze %18 : memref<1x!tpu.dma_semaphore, #tpu.memory_space<semaphore_mem>> -> memref<!tpu.dma_semaphore, #tpu.memory_space<semaphore_mem>>
    tpu.enqueue_dma source(%16 : memref<1x256xf32, #tpu.memory_space<any>>) target(%17 : memref<1x256xf32, #tpu.memory_space<vmem>>) target_semaphore(%19 : memref<!tpu.dma_semaphore, #tpu.memory_space<semaphore_mem>>)
    %c1_i32_7 = arith.constant 1 : i32
    %20 = arith.addi %0, %c1_i32_7 : i32
    %21 = arith.index_cast %20 : i32 to index
    %22 = memref.load %arg1[%21] : memref<256xi32, #tpu.memory_space<smem>>
    %c0_i32_8 = arith.constant 0 : i32
    %c511_i32_9 = arith.constant 511 : i32
    %23 = arith.maxsi %c0_i32_8, %22 : i32
    %24 = arith.minsi %c511_i32_9, %23 : i32
    %c8_i32_10 = arith.constant 8 : i32
    %c0_i32_11 = arith.constant 0 : i32
    %25 = arith.cmpi eq, %c8_i32_10, %c0_i32_11 : i32
    %c1_i32_12 = arith.constant 1 : i32
    %26 = arith.select %25, %c1_i32_12, %c8_i32_10 : i32
    %27 = arith.remsi %c1_i32_7, %26 : i32
    %c0_i32_13 = arith.constant 0 : i32
    %28 = arith.cmpi ne, %27, %c0_i32_13 : i32
    %c0_i32_14 = arith.constant 0 : i32
    %29 = arith.cmpi slt, %27, %c0_i32_14 : i32
    %c0_i32_15 = arith.constant 0 : i32
    %30 = arith.cmpi slt, %26, %c0_i32_15 : i32
    %31 = arith.xori %29, %30 : i1
    %32 = arith.andi %31, %28 : i1
    %33 = arith.addi %27, %26 : i32
    %34 = arith.select %32, %33, %27 : i32
    %c0_i32_16 = arith.constant 0 : i32
    %35 = tpu.memref_slice %arg2[%24, %c0_i32_16] : memref<512x256xf32, #tpu.memory_space<any>> -> memref<1x256xf32, #tpu.memory_space<any>>
    %c0_i32_17 = arith.constant 0 : i32
    %36 = tpu.memref_slice %arg3[%c1_i32_7, %c0_i32_17] : memref<128x256xf32, #tpu.memory_space<vmem>> -> memref<1x256xf32, #tpu.memory_space<vmem>>
    %37 = tpu.memref_slice %arg4[%34] : memref<8x!tpu.dma_semaphore, #tpu.memory_space<semaphore_mem>> -> memref<1x!tpu.dma_semaphore, #tpu.memory_space<semaphore_mem>>
    %38 = tpu.memref_squeeze %37 : memref<1x!tpu.dma_semaphore, #tpu.memory_space<semaphore_mem>> -> memref<!tpu.dma_semaphore, #tpu.memory_space<semaphore_mem>>
    tpu.enqueue_dma source(%35 : memref<1x256xf32, #tpu.memory_space<any>>) target(%36 : memref<1x256xf32, #tpu.memory_space<vmem>>) target_semaphore(%38 : memref<!tpu.dma_semaphore, #tpu.memory_space<semaphore_mem>>)
    %c2_i32 = arith.constant 2 : i32
    %39 = arith.addi %0, %c2_i32 : i32
    %40 = arith.index_cast %39 : i32 to index
    %41 = memref.load %arg1[%40] : memref<256xi32, #tpu.memory_space<smem>>
    %c0_i32_18 = arith.constant 0 : i32
    %c511_i32_19 = arith.constant 511 : i32
    %42 = arith.maxsi %c0_i32_18, %41 : i32
    %43 = arith.minsi %c511_i32_19, %42 : i32
    %c8_i32_20 = arith.constant 8 : i32
    %c0_i32_21 = arith.constant 0 : i32
    %44 = arith.cmpi eq, %c8_i32_20, %c0_i32_21 : i32
    %c1_i32_22 = arith.constant 1 : i32
    %45 = arith.select %44, %c1_i32_22, %c8_i32_20 : i32
    %46 = arith.remsi %c2_i32, %45 : i32
    %c0_i32_23 = arith.constant 0 : i32
    %47 = arith.cmpi ne, %46, %c0_i32_23 : i32
    %c0_i32_24 = arith.constant 0 : i32
    %48 = arith.cmpi slt, %46, %c0_i32_24 : i32
    %c0_i32_25 = arith.constant 0 : i32
    %49 = arith.cmpi slt, %45, %c0_i32_25 : i32
    %50 = arith.xori %48, %49 : i1
    %51 = arith.andi %50, %47 : i1
    %52 = arith.addi %46, %45 : i32
    %53 = arith.select %51, %52, %46 : i32
    %c0_i32_26 = arith.constant 0 : i32
    %54 = tpu.memref_slice %arg2[%43, %c0_i32_26] : memref<512x256xf32, #tpu.memory_space<any>> -> memref<1x256xf32, #tpu.memory_space<any>>
    %c0_i32_27 = arith.constant 0 : i32
    %55 = tpu.memref_slice %arg3[%c2_i32, %c0_i32_27] : memref<128x256xf32, #tpu.memory_space<vmem>> -> memref<1x256xf32, #tpu.memory_space<vmem>>
    %56 = tpu.memref_slice %arg4[%53] : memref<8x!tpu.dma_semaphore, #tpu.memory_space<semaphore_mem>> -> memref<1x!tpu.dma_semaphore, #tpu.memory_space<semaphore_mem>>
    %57 = tpu.memref_squeeze %56 : memref<1x!tpu.dma_semaphore, #tpu.memory_space<semaphore_mem>> -> memref<!tpu.dma_semaphore, #tpu.memory_space<semaphore_mem>>
    tpu.enqueue_dma source(%54 : memref<1x256xf32, #tpu.memory_space<any>>) target(%55 : memref<1x256xf32, #tpu.memory_space<vmem>>) target_semaphore(%57 : memref<!tpu.dma_semaphore, #tpu.memory_space<semaphore_mem>>)
    %c3_i32 = arith.constant 3 : i32
    %58 = arith.addi %0, %c3_i32 : i32
    %59 = arith.index_cast %58 : i32 to index
    %60 = memref.load %arg1[%59] : memref<256xi32, #tpu.memory_space<smem>>
    %c0_i32_28 = arith.constant 0 : i32
    %c511_i32_29 = arith.constant 511 : i32
    %61 = arith.maxsi %c0_i32_28, %60 : i32
    %62 = arith.minsi %c511_i32_29, %61 : i32
    %c8_i32_30 = arith.constant 8 : i32
    %c0_i32_31 = arith.constant 0 : i32
    %63 = arith.cmpi eq, %c8_i32_30, %c0_i32_31 : i32
    %c1_i32_32 = arith.constant 1 : i32
    %64 = arith.select %63, %c1_i32_32, %c8_i32_30 : i32
    %65 = arith.remsi %c3_i32, %64 : i32
    %c0_i32_33 = arith.constant 0 : i32
    %66 = arith.cmpi ne, %65, %c0_i32_33 : i32
    %c0_i32_34 = arith.constant 0 : i32
    %67 = arith.cmpi slt, %65, %c0_i32_34 : i32
    %c0_i32_35 = arith.constant 0 : i32
    %68 = arith.cmpi slt, %64, %c0_i32_35 : i32
    %69 = arith.xori %67, %68 : i1
    %70 = arith.andi %69, %66 : i1
    %71 = arith.addi %65, %64 : i32
    %72 = arith.select %70, %71, %65 : i32
    %c0_i32_36 = arith.constant 0 : i32
    %73 = tpu.memref_slice %arg2[%62, %c0_i32_36] : memref<512x256xf32, #tpu.memory_space<any>> -> memref<1x256xf32, #tpu.memory_space<any>>
    %c0_i32_37 = arith.constant 0 : i32
    %74 = tpu.memref_slice %arg3[%c3_i32, %c0_i32_37] : memref<128x256xf32, #tpu.memory_space<vmem>> -> memref<1x256xf32, #tpu.memory_space<vmem>>
    %75 = tpu.memref_slice %arg4[%72] : memref<8x!tpu.dma_semaphore, #tpu.memory_space<semaphore_mem>> -> memref<1x!tpu.dma_semaphore, #tpu.memory_space<semaphore_mem>>
    %76 = tpu.memref_squeeze %75 : memref<1x!tpu.dma_semaphore, #tpu.memory_space<semaphore_mem>> -> memref<!tpu.dma_semaphore, #tpu.memory_space<semaphore_mem>>
    tpu.enqueue_dma source(%73 : memref<1x256xf32, #tpu.memory_space<any>>) target(%74 : memref<1x256xf32, #tpu.memory_space<vmem>>) target_semaphore(%76 : memref<!tpu.dma_semaphore, #tpu.memory_space<semaphore_mem>>)
    %c4_i32 = arith.constant 4 : i32
    %77 = arith.addi %0, %c4_i32 : i32
    %78 = arith.index_cast %77 : i32 to index
    %79 = memref.load %arg1[%78] : memref<256xi32, #tpu.memory_space<smem>>
    %c0_i32_38 = arith.constant 0 : i32
    %c511_i32_39 = arith.constant 511 : i32
    %80 = arith.maxsi %c0_i32_38, %79 : i32
    %81 = arith.minsi %c511_i32_39, %80 : i32
    %c8_i32_40 = arith.constant 8 : i32
    %c0_i32_41 = arith.constant 0 : i32
    %82 = arith.cmpi eq, %c8_i32_40, %c0_i32_41 : i32
    %c1_i32_42 = arith.constant 1 : i32
    %83 = arith.select %82, %c1_i32_42, %c8_i32_40 : i32
    %84 = arith.remsi %c4_i32, %83 : i32
    %c0_i32_43 = arith.constant 0 : i32
    %85 = arith.cmpi ne, %84, %c0_i32_43 : i32
    %c0_i32_44 = arith.constant 0 : i32
    %86 = arith.cmpi slt, %84, %c0_i32_44 : i32
    %c0_i32_45 = arith.constant 0 : i32
    %87 = arith.cmpi slt, %83, %c0_i32_45 : i32
    %88 = arith.xori %86, %87 : i1
    %89 = arith.andi %88, %85 : i1
    %90 = arith.addi %84, %83 : i32
    %91 = arith.select %89, %90, %84 : i32
    %c0_i32_46 = arith.constant 0 : i32
    %92 = tpu.memref_slice %arg2[%81, %c0_i32_46] : memref<512x256xf32, #tpu.memory_space<any>> -> memref<1x256xf32, #tpu.memory_space<any>>
    %c0_i32_47 = arith.constant 0 : i32
    %93 = tpu.memref_slice %arg3[%c4_i32, %c0_i32_47] : memref<128x256xf32, #tpu.memory_space<vmem>> -> memref<1x256xf32, #tpu.memory_space<vmem>>
    %94 = tpu.memref_slice %arg4[%91] : memref<8x!tpu.dma_semaphore, #tpu.memory_space<semaphore_mem>> -> memref<1x!tpu.dma_semaphore, #tpu.memory_space<semaphore_mem>>
    %95 = tpu.memref_squeeze %94 : memref<1x!tpu.dma_semaphore, #tpu.memory_space<semaphore_mem>> -> memref<!tpu.dma_semaphore, #tpu.memory_space<semaphore_mem>>
    tpu.enqueue_dma source(%92 : memref<1x256xf32, #tpu.memory_space<any>>) target(%93 : memref<1x256xf32, #tpu.memory_space<vmem>>) target_semaphore(%95 : memref<!tpu.dma_semaphore, #tpu.memory_space<semaphore_mem>>)
    %c5_i32 = arith.constant 5 : i32
    %96 = arith.addi %0, %c5_i32 : i32
    %97 = arith.index_cast %96 : i32 to index
    %98 = memref.load %arg1[%97] : memref<256xi32, #tpu.memory_space<smem>>
    %c0_i32_48 = arith.constant 0 : i32
    %c511_i32_49 = arith.constant 511 : i32
    %99 = arith.maxsi %c0_i32_48, %98 : i32
    %100 = arith.minsi %c511_i32_49, %99 : i32
    %c8_i32_50 = arith.constant 8 : i32
    %c0_i32_51 = arith.constant 0 : i32
    %101 = arith.cmpi eq, %c8_i32_50, %c0_i32_51 : i32
    %c1_i32_52 = arith.constant 1 : i32
    %102 = arith.select %101, %c1_i32_52, %c8_i32_50 : i32
    %103 = arith.remsi %c5_i32, %102 : i32
    %c0_i32_53 = arith.constant 0 : i32
    %104 = arith.cmpi ne, %103, %c0_i32_53 : i32
    %c0_i32_54 = arith.constant 0 : i32
    %105 = arith.cmpi slt, %103, %c0_i32_54 : i32
    %c0_i32_55 = arith.constant 0 : i32
    %106 = arith.cmpi slt, %102, %c0_i32_55 : i32
    %107 = arith.xori %105, %106 : i1
    %108 = arith.andi %107, %104 : i1
    %109 = arith.addi %103, %102 : i32
    %110 = arith.select %108, %109, %103 : i32
    %c0_i32_56 = arith.constant 0 : i32
    %111 = tpu.memref_slice %arg2[%100, %c0_i32_56] : memref<512x256xf32, #tpu.memory_space<any>> -> memref<1x256xf32, #tpu.memory_space<any>>
    %c0_i32_57 = arith.constant 0 : i32
    %112 = tpu.memref_slice %arg3[%c5_i32, %c0_i32_57] : memref<128x256xf32, #tpu.memory_space<vmem>> -> memref<1x256xf32, #tpu.memory_space<vmem>>
    %113 = tpu.memref_slice %arg4[%110] : memref<8x!tpu.dma_semaphore, #tpu.memory_space<semaphore_mem>> -> memref<1x!tpu.dma_semaphore, #tpu.memory_space<semaphore_mem>>
    %114 = tpu.memref_squeeze %113 : memref<1x!tpu.dma_semaphore, #tpu.memory_space<semaphore_mem>> -> memref<!tpu.dma_semaphore, #tpu.memory_space<semaphore_mem>>
    tpu.enqueue_dma source(%111 : memref<1x256xf32, #tpu.memory_space<any>>) target(%112 : memref<1x256xf32, #tpu.memory_space<vmem>>) target_semaphore(%114 : memref<!tpu.dma_semaphore, #tpu.memory_space<semaphore_mem>>)
    %c6_i32 = arith.constant 6 : i32
    %115 = arith.addi %0, %c6_i32 : i32
    %116 = arith.index_cast %115 : i32 to index
    %117 = memref.load %arg1[%116] : memref<256xi32, #tpu.memory_space<smem>>
    %c0_i32_58 = arith.constant 0 : i32
    %c511_i32_59 = arith.constant 511 : i32
    %118 = arith.maxsi %c0_i32_58, %117 : i32
    %119 = arith.minsi %c511_i32_59, %118 : i32
    %c8_i32_60 = arith.constant 8 : i32
    %c0_i32_61 = arith.constant 0 : i32
    %120 = arith.cmpi eq, %c8_i32_60, %c0_i32_61 : i32
    %c1_i32_62 = arith.constant 1 : i32
    %121 = arith.select %120, %c1_i32_62, %c8_i32_60 : i32
    %122 = arith.remsi %c6_i32, %121 : i32
    %c0_i32_63 = arith.constant 0 : i32
    %123 = arith.cmpi ne, %122, %c0_i32_63 : i32
    %c0_i32_64 = arith.constant 0 : i32
    %124 = arith.cmpi slt, %122, %c0_i32_64 : i32
    %c0_i32_65 = arith.constant 0 : i32
    %125 = arith.cmpi slt, %121, %c0_i32_65 : i32
    %126 = arith.xori %124, %125 : i1
    %127 = arith.andi %126, %123 : i1
    %128 = arith.addi %122, %121 : i32
    %129 = arith.select %127, %128, %122 : i32
    %c0_i32_66 = arith.constant 0 : i32
    %130 = tpu.memref_slice %arg2[%119, %c0_i32_66] : memref<512x256xf32, #tpu.memory_space<any>> -> memref<1x256xf32, #tpu.memory_space<any>>
    %c0_i32_67 = arith.constant 0 : i32
    %131 = tpu.memref_slice %arg3[%c6_i32, %c0_i32_67] : memref<128x256xf32, #tpu.memory_space<vmem>> -> memref<1x256xf32, #tpu.memory_space<vmem>>
    %132 = tpu.memref_slice %arg4[%129] : memref<8x!tpu.dma_semaphore, #tpu.memory_space<semaphore_mem>> -> memref<1x!tpu.dma_semaphore, #tpu.memory_space<semaphore_mem>>
    %133 = tpu.memref_squeeze %132 : memref<1x!tpu.dma_semaphore, #tpu.memory_space<semaphore_mem>> -> memref<!tpu.dma_semaphore, #tpu.memory_space<semaphore_mem>>
    tpu.enqueue_dma source(%130 : memref<1x256xf32, #tpu.memory_space<any>>) target(%131 : memref<1x256xf32, #tpu.memory_space<vmem>>) target_semaphore(%133 : memref<!tpu.dma_semaphore, #tpu.memory_space<semaphore_mem>>)
    %c7_i32 = arith.constant 7 : i32
    %134 = arith.addi %0, %c7_i32 : i32
    %135 = arith.index_cast %134 : i32 to index
    %136 = memref.load %arg1[%135] : memref<256xi32, #tpu.memory_space<smem>>
    %c0_i32_68 = arith.constant 0 : i32
    %c511_i32_69 = arith.constant 511 : i32
    %137 = arith.maxsi %c0_i32_68, %136 : i32
    %138 = arith.minsi %c511_i32_69, %137 : i32
    %c8_i32_70 = arith.constant 8 : i32
    %c0_i32_71 = arith.constant 0 : i32
    %139 = arith.cmpi eq, %c8_i32_70, %c0_i32_71 : i32
    %c1_i32_72 = arith.constant 1 : i32
    %140 = arith.select %139, %c1_i32_72, %c8_i32_70 : i32
    %141 = arith.remsi %c7_i32, %140 : i32
    %c0_i32_73 = arith.constant 0 : i32
    %142 = arith.cmpi ne, %141, %c0_i32_73 : i32
    %c0_i32_74 = arith.constant 0 : i32
    %143 = arith.cmpi slt, %141, %c0_i32_74 : i32
    %c0_i32_75 = arith.constant 0 : i32
    %144 = arith.cmpi slt, %140, %c0_i32_75 : i32
    %145 = arith.xori %143, %144 : i1
    %146 = arith.andi %145, %142 : i1
    %147 = arith.addi %141, %140 : i32
    %148 = arith.select %146, %147, %141 : i32
    %c0_i32_76 = arith.constant 0 : i32
    %149 = tpu.memref_slice %arg2[%138, %c0_i32_76] : memref<512x256xf32, #tpu.memory_space<any>> -> memref<1x256xf32, #tpu.memory_space<any>>
    %c0_i32_77 = arith.constant 0 : i32
    %150 = tpu.memref_slice %arg3[%c7_i32, %c0_i32_77] : memref<128x256xf32, #tpu.memory_space<vmem>> -> memref<1x256xf32, #tpu.memory_space<vmem>>
    %151 = tpu.memref_slice %arg4[%148] : memref<8x!tpu.dma_semaphore, #tpu.memory_space<semaphore_mem>> -> memref<1x!tpu.dma_semaphore, #tpu.memory_space<semaphore_mem>>
    %152 = tpu.memref_squeeze %151 : memref<1x!tpu.dma_semaphore, #tpu.memory_space<semaphore_mem>> -> memref<!tpu.dma_semaphore, #tpu.memory_space<semaphore_mem>>
    tpu.enqueue_dma source(%149 : memref<1x256xf32, #tpu.memory_space<any>>) target(%150 : memref<1x256xf32, #tpu.memory_space<vmem>>) target_semaphore(%152 : memref<!tpu.dma_semaphore, #tpu.memory_space<semaphore_mem>>)
    %c8_i32_78 = arith.constant 8 : i32
    %c8_i32_79 = arith.constant 8 : i32
    %c120_i32 = arith.constant 120 : i32
    %153 = arith.addi %c8_i32_79, %c120_i32 : i32
    %c1_i32_80 = arith.constant 1 : i32
    scf.for %arg5 = %c8_i32_79 to %153 step %c1_i32_80  : i32 {
      %c8_i32_171 = arith.constant 8 : i32
      %274 = arith.subi %arg5, %c8_i32_171 : i32
      %c8_i32_172 = arith.constant 8 : i32
      %c0_i32_173 = arith.constant 0 : i32
      %275 = arith.cmpi eq, %c8_i32_172, %c0_i32_173 : i32
      %c1_i32_174 = arith.constant 1 : i32
      %276 = arith.select %275, %c1_i32_174, %c8_i32_172 : i32
      %277 = arith.remsi %274, %276 : i32
      %c0_i32_175 = arith.constant 0 : i32
      %278 = arith.cmpi ne, %277, %c0_i32_175 : i32
      %c0_i32_176 = arith.constant 0 : i32
      %279 = arith.cmpi slt, %277, %c0_i32_176 : i32
      %c0_i32_177 = arith.constant 0 : i32
      %280 = arith.cmpi slt, %276, %c0_i32_177 : i32
      %281 = arith.xori %279, %280 : i1
      %282 = arith.andi %281, %278 : i1
      %283 = arith.addi %277, %276 : i32
      %284 = arith.select %282, %283, %277 : i32
      %c0_i32_178 = arith.constant 0 : i32
      %c0_i32_179 = arith.constant 0 : i32
      %285 = tpu.memref_slice %arg2[%c0_i32_178, %c0_i32_179] : memref<512x256xf32, #tpu.memory_space<any>> -> memref<1x256xf32, #tpu.memory_space<any>>
      %c0_i32_180 = arith.constant 0 : i32
      %286 = tpu.memref_slice %arg3[%274, %c0_i32_180] : memref<128x256xf32, #tpu.memory_space<vmem>> -> memref<1x256xf32, #tpu.memory_space<vmem>>
      %287 = tpu.memref_slice %arg4[%284] : memref<8x!tpu.dma_semaphore, #tpu.memory_space<semaphore_mem>> -> memref<1x!tpu.dma_semaphore, #tpu.memory_space<semaphore_mem>>
      %288 = tpu.memref_squeeze %287 : memref<1x!tpu.dma_semaphore, #tpu.memory_space<semaphore_mem>> -> memref<!tpu.dma_semaphore, #tpu.memory_space<semaphore_mem>>
      tpu.wait_dma2 semaphore(%288 : memref<!tpu.dma_semaphore, #tpu.memory_space<semaphore_mem>>) src(%285 : memref<1x256xf32, #tpu.memory_space<any>>) dst(%286 : memref<1x256xf32, #tpu.memory_space<vmem>>)
      %289 = arith.addi %0, %arg5 : i32
      %290 = arith.index_cast %289 : i32 to index
      %291 = memref.load %arg1[%290] : memref<256xi32, #tpu.memory_space<smem>>
      %c0_i32_181 = arith.constant 0 : i32
      %c511_i32_182 = arith.constant 511 : i32
      %292 = arith.maxsi %c0_i32_181, %291 : i32
      %293 = arith.minsi %c511_i32_182, %292 : i32
      %c8_i32_183 = arith.constant 8 : i32
      %c0_i32_184 = arith.constant 0 : i32
      %294 = arith.cmpi eq, %c8_i32_183, %c0_i32_184 : i32
      %c1_i32_185 = arith.constant 1 : i32
      %295 = arith.select %294, %c1_i32_185, %c8_i32_183 : i32
      %296 = arith.remsi %arg5, %295 : i32
      %c0_i32_186 = arith.constant 0 : i32
      %297 = arith.cmpi ne, %296, %c0_i32_186 : i32
      %c0_i32_187 = arith.constant 0 : i32
      %298 = arith.cmpi slt, %296, %c0_i32_187 : i32
      %c0_i32_188 = arith.constant 0 : i32
      %299 = arith.cmpi slt, %295, %c0_i32_188 : i32
      %300 = arith.xori %298, %299 : i1
      %301 = arith.andi %300, %297 : i1
      %302 = arith.addi %296, %295 : i32
      %303 = arith.select %301, %302, %296 : i32
      %c0_i32_189 = arith.constant 0 : i32
      %304 = tpu.memref_slice %arg2[%293, %c0_i32_189] : memref<512x256xf32, #tpu.memory_space<any>> -> memref<1x256xf32, #tpu.memory_space<any>>
      %c0_i32_190 = arith.constant 0 : i32
      %305 = tpu.memref_slice %arg3[%arg5, %c0_i32_190] : memref<128x256xf32, #tpu.memory_space<vmem>> -> memref<1x256xf32, #tpu.memory_space<vmem>>
      %306 = tpu.memref_slice %arg4[%303] : memref<8x!tpu.dma_semaphore, #tpu.memory_space<semaphore_mem>> -> memref<1x!tpu.dma_semaphore, #tpu.memory_space<semaphore_mem>>
      %307 = tpu.memref_squeeze %306 : memref<1x!tpu.dma_semaphore, #tpu.memory_space<semaphore_mem>> -> memref<!tpu.dma_semaphore, #tpu.memory_space<semaphore_mem>>
      tpu.enqueue_dma source(%304 : memref<1x256xf32, #tpu.memory_space<any>>) target(%305 : memref<1x256xf32, #tpu.memory_space<vmem>>) target_semaphore(%307 : memref<!tpu.dma_semaphore, #tpu.memory_space<semaphore_mem>>)
    }
    %c120_i32_81 = arith.constant 120 : i32
    %c0_i32_82 = arith.constant 0 : i32
    %c120_i32_83 = arith.constant 120 : i32
    %154 = arith.addi %c120_i32_83, %c0_i32_82 : i32
    %c8_i32_84 = arith.constant 8 : i32
    %c0_i32_85 = arith.constant 0 : i32
    %155 = arith.cmpi eq, %c8_i32_84, %c0_i32_85 : i32
    %c1_i32_86 = arith.constant 1 : i32
    %156 = arith.select %155, %c1_i32_86, %c8_i32_84 : i32
    %157 = arith.remsi %154, %156 : i32
    %c0_i32_87 = arith.constant 0 : i32
    %158 = arith.cmpi ne, %157, %c0_i32_87 : i32
    %c0_i32_88 = arith.constant 0 : i32
    %159 = arith.cmpi slt, %157, %c0_i32_88 : i32
    %c0_i32_89 = arith.constant 0 : i32
    %160 = arith.cmpi slt, %156, %c0_i32_89 : i32
    %161 = arith.xori %159, %160 : i1
    %162 = arith.andi %161, %158 : i1
    %163 = arith.addi %157, %156 : i32
    %164 = arith.select %162, %163, %157 : i32
    %c0_i32_90 = arith.constant 0 : i32
    %c0_i32_91 = arith.constant 0 : i32
    %165 = tpu.memref_slice %arg2[%c0_i32_90, %c0_i32_91] : memref<512x256xf32, #tpu.memory_space<any>> -> memref<1x256xf32, #tpu.memory_space<any>>
    %c0_i32_92 = arith.constant 0 : i32
    %166 = tpu.memref_slice %arg3[%154, %c0_i32_92] : memref<128x256xf32, #tpu.memory_space<vmem>> -> memref<1x256xf32, #tpu.memory_space<vmem>>
    %167 = tpu.memref_slice %arg4[%164] : memref<8x!tpu.dma_semaphore, #tpu.memory_space<semaphore_mem>> -> memref<1x!tpu.dma_semaphore, #tpu.memory_space<semaphore_mem>>
    %168 = tpu.memref_squeeze %167 : memref<1x!tpu.dma_semaphore, #tpu.memory_space<semaphore_mem>> -> memref<!tpu.dma_semaphore, #tpu.memory_space<semaphore_mem>>
    tpu.wait_dma2 semaphore(%168 : memref<!tpu.dma_semaphore, #tpu.memory_space<semaphore_mem>>) src(%165 : memref<1x256xf32, #tpu.memory_space<any>>) dst(%166 : memref<1x256xf32, #tpu.memory_space<vmem>>)
    %c1_i32_93 = arith.constant 1 : i32
    %c120_i32_94 = arith.constant 120 : i32
    %169 = arith.addi %c120_i32_94, %c1_i32_93 : i32
    %c8_i32_95 = arith.constant 8 : i32
    %c0_i32_96 = arith.constant 0 : i32
    %170 = arith.cmpi eq, %c8_i32_95, %c0_i32_96 : i32
    %c1_i32_97 = arith.constant 1 : i32
    %171 = arith.select %170, %c1_i32_97, %c8_i32_95 : i32
    %172 = arith.remsi %169, %171 : i32
    %c0_i32_98 = arith.constant 0 : i32
    %173 = arith.cmpi ne, %172, %c0_i32_98 : i32
    %c0_i32_99 = arith.constant 0 : i32
    %174 = arith.cmpi slt, %172, %c0_i32_99 : i32
    %c0_i32_100 = arith.constant 0 : i32
    %175 = arith.cmpi slt, %171, %c0_i32_100 : i32
    %176 = arith.xori %174, %175 : i1
    %177 = arith.andi %176, %173 : i1
    %178 = arith.addi %172, %171 : i32
    %179 = arith.select %177, %178, %172 : i32
    %c0_i32_101 = arith.constant 0 : i32
    %c0_i32_102 = arith.constant 0 : i32
    %180 = tpu.memref_slice %arg2[%c0_i32_101, %c0_i32_102] : memref<512x256xf32, #tpu.memory_space<any>> -> memref<1x256xf32, #tpu.memory_space<any>>
    %c0_i32_103 = arith.constant 0 : i32
    %181 = tpu.memref_slice %arg3[%169, %c0_i32_103] : memref<128x256xf32, #tpu.memory_space<vmem>> -> memref<1x256xf32, #tpu.memory_space<vmem>>
    %182 = tpu.memref_slice %arg4[%179] : memref<8x!tpu.dma_semaphore, #tpu.memory_space<semaphore_mem>> -> memref<1x!tpu.dma_semaphore, #tpu.memory_space<semaphore_mem>>
    %183 = tpu.memref_squeeze %182 : memref<1x!tpu.dma_semaphore, #tpu.memory_space<semaphore_mem>> -> memref<!tpu.dma_semaphore, #tpu.memory_space<semaphore_mem>>
    tpu.wait_dma2 semaphore(%183 : memref<!tpu.dma_semaphore, #tpu.memory_space<semaphore_mem>>) src(%180 : memref<1x256xf32, #tpu.memory_space<any>>) dst(%181 : memref<1x256xf32, #tpu.memory_space<vmem>>)
    %c2_i32_104 = arith.constant 2 : i32
    %c120_i32_105 = arith.constant 120 : i32
    %184 = arith.addi %c120_i32_105, %c2_i32_104 : i32
    %c8_i32_106 = arith.constant 8 : i32
    %c0_i32_107 = arith.constant 0 : i32
    %185 = arith.cmpi eq, %c8_i32_106, %c0_i32_107 : i32
    %c1_i32_108 = arith.constant 1 : i32
    %186 = arith.select %185, %c1_i32_108, %c8_i32_106 : i32
    %187 = arith.remsi %184, %186 : i32
    %c0_i32_109 = arith.constant 0 : i32
    %188 = arith.cmpi ne, %187, %c0_i32_109 : i32
    %c0_i32_110 = arith.constant 0 : i32
    %189 = arith.cmpi slt, %187, %c0_i32_110 : i32
    %c0_i32_111 = arith.constant 0 : i32
    %190 = arith.cmpi slt, %186, %c0_i32_111 : i32
    %191 = arith.xori %189, %190 : i1
    %192 = arith.andi %191, %188 : i1
    %193 = arith.addi %187, %186 : i32
    %194 = arith.select %192, %193, %187 : i32
    %c0_i32_112 = arith.constant 0 : i32
    %c0_i32_113 = arith.constant 0 : i32
    %195 = tpu.memref_slice %arg2[%c0_i32_112, %c0_i32_113] : memref<512x256xf32, #tpu.memory_space<any>> -> memref<1x256xf32, #tpu.memory_space<any>>
    %c0_i32_114 = arith.constant 0 : i32
    %196 = tpu.memref_slice %arg3[%184, %c0_i32_114] : memref<128x256xf32, #tpu.memory_space<vmem>> -> memref<1x256xf32, #tpu.memory_space<vmem>>
    %197 = tpu.memref_slice %arg4[%194] : memref<8x!tpu.dma_semaphore, #tpu.memory_space<semaphore_mem>> -> memref<1x!tpu.dma_semaphore, #tpu.memory_space<semaphore_mem>>
    %198 = tpu.memref_squeeze %197 : memref<1x!tpu.dma_semaphore, #tpu.memory_space<semaphore_mem>> -> memref<!tpu.dma_semaphore, #tpu.memory_space<semaphore_mem>>
    tpu.wait_dma2 semaphore(%198 : memref<!tpu.dma_semaphore, #tpu.memory_space<semaphore_mem>>) src(%195 : memref<1x256xf32, #tpu.memory_space<any>>) dst(%196 : memref<1x256xf32, #tpu.memory_space<vmem>>)
    %c3_i32_115 = arith.constant 3 : i32
    %c120_i32_116 = arith.constant 120 : i32
    %199 = arith.addi %c120_i32_116, %c3_i32_115 : i32
    %c8_i32_117 = arith.constant 8 : i32
    %c0_i32_118 = arith.constant 0 : i32
    %200 = arith.cmpi eq, %c8_i32_117, %c0_i32_118 : i32
    %c1_i32_119 = arith.constant 1 : i32
    %201 = arith.select %200, %c1_i32_119, %c8_i32_117 : i32
    %202 = arith.remsi %199, %201 : i32
    %c0_i32_120 = arith.constant 0 : i32
    %203 = arith.cmpi ne, %202, %c0_i32_120 : i32
    %c0_i32_121 = arith.constant 0 : i32
    %204 = arith.cmpi slt, %202, %c0_i32_121 : i32
    %c0_i32_122 = arith.constant 0 : i32
    %205 = arith.cmpi slt, %201, %c0_i32_122 : i32
    %206 = arith.xori %204, %205 : i1
    %207 = arith.andi %206, %203 : i1
    %208 = arith.addi %202, %201 : i32
    %209 = arith.select %207, %208, %202 : i32
    %c0_i32_123 = arith.constant 0 : i32
    %c0_i32_124 = arith.constant 0 : i32
    %210 = tpu.memref_slice %arg2[%c0_i32_123, %c0_i32_124] : memref<512x256xf32, #tpu.memory_space<any>> -> memref<1x256xf32, #tpu.memory_space<any>>
    %c0_i32_125 = arith.constant 0 : i32
    %211 = tpu.memref_slice %arg3[%199, %c0_i32_125] : memref<128x256xf32, #tpu.memory_space<vmem>> -> memref<1x256xf32, #tpu.memory_space<vmem>>
    %212 = tpu.memref_slice %arg4[%209] : memref<8x!tpu.dma_semaphore, #tpu.memory_space<semaphore_mem>> -> memref<1x!tpu.dma_semaphore, #tpu.memory_space<semaphore_mem>>
    %213 = tpu.memref_squeeze %212 : memref<1x!tpu.dma_semaphore, #tpu.memory_space<semaphore_mem>> -> memref<!tpu.dma_semaphore, #tpu.memory_space<semaphore_mem>>
    tpu.wait_dma2 semaphore(%213 : memref<!tpu.dma_semaphore, #tpu.memory_space<semaphore_mem>>) src(%210 : memref<1x256xf32, #tpu.memory_space<any>>) dst(%211 : memref<1x256xf32, #tpu.memory_space<vmem>>)
    %c4_i32_126 = arith.constant 4 : i32
    %c120_i32_127 = arith.constant 120 : i32
    %214 = arith.addi %c120_i32_127, %c4_i32_126 : i32
    %c8_i32_128 = arith.constant 8 : i32
    %c0_i32_129 = arith.constant 0 : i32
    %215 = arith.cmpi eq, %c8_i32_128, %c0_i32_129 : i32
    %c1_i32_130 = arith.constant 1 : i32
    %216 = arith.select %215, %c1_i32_130, %c8_i32_128 : i32
    %217 = arith.remsi %214, %216 : i32
    %c0_i32_131 = arith.constant 0 : i32
    %218 = arith.cmpi ne, %217, %c0_i32_131 : i32
    %c0_i32_132 = arith.constant 0 : i32
    %219 = arith.cmpi slt, %217, %c0_i32_132 : i32
    %c0_i32_133 = arith.constant 0 : i32
    %220 = arith.cmpi slt, %216, %c0_i32_133 : i32
    %221 = arith.xori %219, %220 : i1
    %222 = arith.andi %221, %218 : i1
    %223 = arith.addi %217, %216 : i32
    %224 = arith.select %222, %223, %217 : i32
    %c0_i32_134 = arith.constant 0 : i32
    %c0_i32_135 = arith.constant 0 : i32
    %225 = tpu.memref_slice %arg2[%c0_i32_134, %c0_i32_135] : memref<512x256xf32, #tpu.memory_space<any>> -> memref<1x256xf32, #tpu.memory_space<any>>
    %c0_i32_136 = arith.constant 0 : i32
    %226 = tpu.memref_slice %arg3[%214, %c0_i32_136] : memref<128x256xf32, #tpu.memory_space<vmem>> -> memref<1x256xf32, #tpu.memory_space<vmem>>
    %227 = tpu.memref_slice %arg4[%224] : memref<8x!tpu.dma_semaphore, #tpu.memory_space<semaphore_mem>> -> memref<1x!tpu.dma_semaphore, #tpu.memory_space<semaphore_mem>>
    %228 = tpu.memref_squeeze %227 : memref<1x!tpu.dma_semaphore, #tpu.memory_space<semaphore_mem>> -> memref<!tpu.dma_semaphore, #tpu.memory_space<semaphore_mem>>
    tpu.wait_dma2 semaphore(%228 : memref<!tpu.dma_semaphore, #tpu.memory_space<semaphore_mem>>) src(%225 : memref<1x256xf32, #tpu.memory_space<any>>) dst(%226 : memref<1x256xf32, #tpu.memory_space<vmem>>)
    %c5_i32_137 = arith.constant 5 : i32
    %c120_i32_138 = arith.constant 120 : i32
    %229 = arith.addi %c120_i32_138, %c5_i32_137 : i32
    %c8_i32_139 = arith.constant 8 : i32
    %c0_i32_140 = arith.constant 0 : i32
    %230 = arith.cmpi eq, %c8_i32_139, %c0_i32_140 : i32
    %c1_i32_141 = arith.constant 1 : i32
    %231 = arith.select %230, %c1_i32_141, %c8_i32_139 : i32
    %232 = arith.remsi %229, %231 : i32
    %c0_i32_142 = arith.constant 0 : i32
    %233 = arith.cmpi ne, %232, %c0_i32_142 : i32
    %c0_i32_143 = arith.constant 0 : i32
    %234 = arith.cmpi slt, %232, %c0_i32_143 : i32
    %c0_i32_144 = arith.constant 0 : i32
    %235 = arith.cmpi slt, %231, %c0_i32_144 : i32
    %236 = arith.xori %234, %235 : i1
    %237 = arith.andi %236, %233 : i1
    %238 = arith.addi %232, %231 : i32
    %239 = arith.select %237, %238, %232 : i32
    %c0_i32_145 = arith.constant 0 : i32
    %c0_i32_146 = arith.constant 0 : i32
    %240 = tpu.memref_slice %arg2[%c0_i32_145, %c0_i32_146] : memref<512x256xf32, #tpu.memory_space<any>> -> memref<1x256xf32, #tpu.memory_space<any>>
    %c0_i32_147 = arith.constant 0 : i32
    %241 = tpu.memref_slice %arg3[%229, %c0_i32_147] : memref<128x256xf32, #tpu.memory_space<vmem>> -> memref<1x256xf32, #tpu.memory_space<vmem>>
    %242 = tpu.memref_slice %arg4[%239] : memref<8x!tpu.dma_semaphore, #tpu.memory_space<semaphore_mem>> -> memref<1x!tpu.dma_semaphore, #tpu.memory_space<semaphore_mem>>
    %243 = tpu.memref_squeeze %242 : memref<1x!tpu.dma_semaphore, #tpu.memory_space<semaphore_mem>> -> memref<!tpu.dma_semaphore, #tpu.memory_space<semaphore_mem>>
    tpu.wait_dma2 semaphore(%243 : memref<!tpu.dma_semaphore, #tpu.memory_space<semaphore_mem>>) src(%240 : memref<1x256xf32, #tpu.memory_space<any>>) dst(%241 : memref<1x256xf32, #tpu.memory_space<vmem>>)
    %c6_i32_148 = arith.constant 6 : i32
    %c120_i32_149 = arith.constant 120 : i32
    %244 = arith.addi %c120_i32_149, %c6_i32_148 : i32
    %c8_i32_150 = arith.constant 8 : i32
    %c0_i32_151 = arith.constant 0 : i32
    %245 = arith.cmpi eq, %c8_i32_150, %c0_i32_151 : i32
    %c1_i32_152 = arith.constant 1 : i32
    %246 = arith.select %245, %c1_i32_152, %c8_i32_150 : i32
    %247 = arith.remsi %244, %246 : i32
    %c0_i32_153 = arith.constant 0 : i32
    %248 = arith.cmpi ne, %247, %c0_i32_153 : i32
    %c0_i32_154 = arith.constant 0 : i32
    %249 = arith.cmpi slt, %247, %c0_i32_154 : i32
    %c0_i32_155 = arith.constant 0 : i32
    %250 = arith.cmpi slt, %246, %c0_i32_155 : i32
    %251 = arith.xori %249, %250 : i1
    %252 = arith.andi %251, %248 : i1
    %253 = arith.addi %247, %246 : i32
    %254 = arith.select %252, %253, %247 : i32
    %c0_i32_156 = arith.constant 0 : i32
    %c0_i32_157 = arith.constant 0 : i32
    %255 = tpu.memref_slice %arg2[%c0_i32_156, %c0_i32_157] : memref<512x256xf32, #tpu.memory_space<any>> -> memref<1x256xf32, #tpu.memory_space<any>>
    %c0_i32_158 = arith.constant 0 : i32
    %256 = tpu.memref_slice %arg3[%244, %c0_i32_158] : memref<128x256xf32, #tpu.memory_space<vmem>> -> memref<1x256xf32, #tpu.memory_space<vmem>>
    %257 = tpu.memref_slice %arg4[%254] : memref<8x!tpu.dma_semaphore, #tpu.memory_space<semaphore_mem>> -> memref<1x!tpu.dma_semaphore, #tpu.memory_space<semaphore_mem>>
    %258 = tpu.memref_squeeze %257 : memref<1x!tpu.dma_semaphore, #tpu.memory_space<semaphore_mem>> -> memref<!tpu.dma_semaphore, #tpu.memory_space<semaphore_mem>>
    tpu.wait_dma2 semaphore(%258 : memref<!tpu.dma_semaphore, #tpu.memory_space<semaphore_mem>>) src(%255 : memref<1x256xf32, #tpu.memory_space<any>>) dst(%256 : memref<1x256xf32, #tpu.memory_space<vmem>>)
    %c7_i32_159 = arith.constant 7 : i32
    %c120_i32_160 = arith.constant 120 : i32
    %259 = arith.addi %c120_i32_160, %c7_i32_159 : i32
    %c8_i32_161 = arith.constant 8 : i32
    %c0_i32_162 = arith.constant 0 : i32
    %260 = arith.cmpi eq, %c8_i32_161, %c0_i32_162 : i32
    %c1_i32_163 = arith.constant 1 : i32
    %261 = arith.select %260, %c1_i32_163, %c8_i32_161 : i32
    %262 = arith.remsi %259, %261 : i32
    %c0_i32_164 = arith.constant 0 : i32
    %263 = arith.cmpi ne, %262, %c0_i32_164 : i32
    %c0_i32_165 = arith.constant 0 : i32
    %264 = arith.cmpi slt, %262, %c0_i32_165 : i32
    %c0_i32_166 = arith.constant 0 : i32
    %265 = arith.cmpi slt, %261, %c0_i32_166 : i32
    %266 = arith.xori %264, %265 : i1
    %267 = arith.andi %266, %263 : i1
    %268 = arith.addi %262, %261 : i32
    %269 = arith.select %267, %268, %262 : i32
    %c0_i32_167 = arith.constant 0 : i32
    %c0_i32_168 = arith.constant 0 : i32
    %270 = tpu.memref_slice %arg2[%c0_i32_167, %c0_i32_168] : memref<512x256xf32, #tpu.memory_space<any>> -> memref<1x256xf32, #tpu.memory_space<any>>
    %c0_i32_169 = arith.constant 0 : i32
    %271 = tpu.memref_slice %arg3[%259, %c0_i32_169] : memref<128x256xf32, #tpu.memory_space<vmem>> -> memref<1x256xf32, #tpu.memory_space<vmem>>
    %272 = tpu.memref_slice %arg4[%269] : memref<8x!tpu.dma_semaphore, #tpu.memory_space<semaphore_mem>> -> memref<1x!tpu.dma_semaphore, #tpu.memory_space<semaphore_mem>>
    %273 = tpu.memref_squeeze %272 : memref<1x!tpu.dma_semaphore, #tpu.memory_space<semaphore_mem>> -> memref<!tpu.dma_semaphore, #tpu.memory_space<semaphore_mem>>
    tpu.wait_dma2 semaphore(%273 : memref<!tpu.dma_semaphore, #tpu.memory_space<semaphore_mem>>) src(%270 : memref<1x256xf32, #tpu.memory_space<any>>) dst(%271 : memref<1x256xf32, #tpu.memory_space<vmem>>)
    %c8_i32_170 = arith.constant 8 : i32
    return
  }
  func.func @transform_1(%arg0: i32, %arg1: memref<256xi32, #tpu.memory_space<smem>>) -> (i32, i32) {
    %c0_i32 = arith.constant 0 : i32
    %c0_i32_0 = arith.constant 0 : i32
    return %arg0, %c0_i32 : i32, i32
  }
}

</mosaic_0001>

<bundles_post_ra>
// kernel: tpu_custom_call.1
= control target key start
LH: loop header
LB: loop body
LE: loop exit
PB: predicated region body
PF: predicated region fallthrough
CT: control target
= control target key end

     0   :  { %s1268_s0 = inlined_call_operand.hbm [shape: s32[256], index: 0, kind: input, shape index: {}]   ;;  %s1269_s1 = inlined_call_operand.hbm [shape: f32[512,256], index: 1, kind: input, shape index: {}]   ;;  %s1270_s2 = inlined_call_operand.hbm [shape: f32[256,256], index: 2, kind: output, shape index: {}]  }
   0x1   :  { %1284 = sst [smem:[#allocation32_spill]] %s1270_s2  ;;  %s596_s11 = scalar_lea.hbm %s1268_s0, 32 }
   0x2   :  { %p597_p0 = scmp.ne.s32.totalorder %s1268_s0, %s596_s11  ;;  %p600_p1 = scmp.lt.u32.totalorder %s596_s11, %s1268_s0 }
   0x4   :  { %p602_p2 = pnand %p600_p1, %p597_p0 }
   0x6   :  { %605 = shalt.err (!%p602_p2)  }
   0x7   :  { %s906_s16 = smov [#allocation4]  }
   0x8   :  { %8 = dma.hbm_to_smem %s1268_s0, 32, %s906_s16, [#allocation3] }
   0x9   :  { %866 = dma.done.wait [#allocation3], 32 }
   0xa   :  { %867 = vsyncadd [#allocation3], 4294967264 }
   0xb   :  { %10 = sfence }
   0xc   :  { %11 = vsyncpa [#allocation6], 0 }
   0xd   :  { %13 = vsyncpa [#allocation6 + $0x1], 0  ;;  %s941_s19 = smov 0   ;;  %s943_s20 = smov 0  }
   0xe   :  { %s945_s21 = smov 0  }
   0xf LB: > { %1285 = sst [smem:[#allocation27_spill]] %s892_s19  ;;  %s440_s0 = sadd.s32 4294967295, %s900_s21   ;;  %s900_s21 = sphi %s945_s21, %s1307_s21   ;;  %s896_s20 = sphi %s943_s20, %s1310_s20   ;;  %s892_s19 = sphi %s941_s19, %s1309_s19  }
  0x10   : > { %s958_s22 = sadd.s32 1, %s900_s21   ;;  %s25_s24 = sadd.s32 1, %s896_s20 }
  0x11   : > { %1286 = sst [smem:[#allocation28_spill]] %s958_s22  ;;  %s22_s23 = ssub.s32 %s900_s21, %s958_s22 }
  0x12   : > { %p23_p3 = scmp.eq.s32.totalorder %s22_s23, 0  ;;  %p441_p4 = scmp.ne.s32.totalorder %s22_s23, 0 }
  0x13   : > { %p29_p5 = scmp.eq.s32.totalorder %s900_s21, 1  ;;  %p34_p6 = scmp.ne.s32.totalorder %s896_s20, %s892_s19 }
  0x14   : > { %s967_s25 = scalar_select %p23_p3, %s896_s20, %s25_s24  }
  0x15   : > { %p969_p7 = por %p441_p4, %p29_p5  ;;  %p35_p8 = scmp.eq.s32.totalorder %s440_s0, 1 }
  0x16   : > { %1287 = sst [smem:[#allocation29_spill]] %s967_s25  ;;  %p442_p10 = scmp.ge.s32.totalorder %s900_s21, 2 }
  0x17   : > { %s1288_s26 = scalar_select %p969_p7, 1, 0 }
  0x18   : > { %p973_p9 = por %p35_p8, %p34_p6  ;;  %44 = sbr.rel (%p442_p10) target bundleno = 352 (0x160), region = 12 }
  0x19   : > { %1289 = sst [smem:[#allocation30_spill]] %s1288_s26  ;;  %s1271_s28 = sand.u32 (!%p442_p10), 1, %s896_s20  }
  0x1a   : > { %s1290_s27 = scalar_select %p973_p9, 1, 0 }
  0x1b   : > { %s980_s29 = sshll.u32 (!%p442_p10), %s900_s21, 7  ;;  %s443_s30 = sshll.u32 (!%p442_p10), %s1271_s28, 8 }
  0x1c   : > { %1291 = sst [smem:[#allocation31_spill]] %s1290_s27  ;;  %s985_s4 = scalar_lea.vmem (!%p442_p10), [#allocation5], %s443_s30 }
  0x1d   : > { %s54_s3 = sld [smem:[#allocation4 + %s980_s29]] (!%p442_p10)  ;;  %s66_s5 = sshll.u32 (!%p442_p10), %s985_s4, 4  ;;  %s988_s5 = int_to_ptr.vmem [resolvable:$true] %s66_s5 }
  0x1e   : > { %s70_s6 = sadd.s32 (!%p442_p10), 1, %s980_s29  ;;  %s82_s8 = scalar_lea.vmem (!%p442_p10), %s985_s4, 1 [#allocation5] }
  0x1f   : > { %s991_s7 = sld [smem:[#allocation4 + %s70_s6]]  ;;  %s85_s9 = sshll.u32 %s82_s8, 4  ;;  %s995_s9 = int_to_ptr.vmem [resolvable:$true] %s85_s9 }
  0x20   : > { %s89_s10 = sadd.s32 2, %s980_s29  ;;  %s101_s12 = scalar_lea.vmem %s985_s4, 2 [#allocation5] }
  0x21   : > { %s997_s11 = sld [smem:[#allocation4 + %s89_s10]]  ;;  %s104_s0 = sshll.u32 %s101_s12, 4  ;;  %s1008_s0 = int_to_ptr.vmem [resolvable:$true] %s104_s0 }
  0x22   : > { %s1013_s28 = scalar_lea.hbm %s1269_s1, 16384 }
  0x23   : > { %p55_p11 = scmp.gt.s32.totalorder %s54_s3, 0  ;;  %p445_p12 = scmp.lt.s32.totalorder %s54_s3, 511 }
  0x25   : > { %s1312_s3 = smov (!%p55_p11, %s54_s3), 0  ;;  %p72_p13 = scmp.gt.s32.totalorder %s991_s7, 0 }
  0x26   : > { %s1314_s3 = smov (!%p445_p12, %s1312_s3), 511  ;;  %p452_p0 = scmp.lt.s32.totalorder %s991_s7, 511 }
  0x27   : > { %s59_s14 = sshrl.u32 %s1314_s3, 3  ;;  %s60_s15 = sand.u32 7, %s1314_s3  }
  0x28   : > { %s450_s16 = sshll.u32 %s59_s14, 4  ;;  %p91_p1 = scmp.gt.s32.totalorder %s997_s11, 0 }
  0x29   : > { %s62_s17 = sadd.s32 %s450_s16, %s60_s15  ;;  %p459_p2 = scmp.lt.s32.totalorder %s997_s11, 511 }
  0x2a   : > { %s451_s18 = sshll.u32 %s62_s17, 4 }
  0x2b   : > { %s64_s30 = scalar_lea.hbm %s1269_s1, %s451_s18 }
  0x2c   : > { %s606_s6 = scalar_lea.hbm %s64_s30, 32  ;;  %p609_p4 = scmp.lt.u32.totalorder %s64_s30, %s1269_s1 }
  0x2d   : > { %p607_p3 = scmp.ne.s32.totalorder %s64_s30, %s606_s6  ;;  %p610_p5 = scmp.lt.u32.totalorder %s1013_s28, %s606_s6 }
  0x2e   : > { %p612_p8 = scmp.lt.u32.totalorder %s606_s6, %s64_s30 }
  0x2f   : > { %p611_p6 = por %p610_p5, %p609_p4 }
  0x31   : > { %p613_p10 = por %p612_p8, %p611_p6 }
  0x33   : > { %p614_p11 = pnand %p613_p10, %p607_p3 }
  0x35   : > { %617 = shalt.err (!%p614_p11)  }
  0x36   : > { %s618_s12 = scalar_lea.vmem %s988_s5, 32  ;;  %s907_s15 = smov [#allocation5]  }
  0x37   : > { %p619_p12 = scmp.ne.s32.totalorder %s988_s5, %s618_s12  ;;  %s620_s16 = sshll.u32 %s907_s15, 4  ;;  %s1021_s16 = int_to_ptr.vmem [resolvable:$false] %s620_s16 }
  0x38   : > { %s1024_s17 = scalar_lea.vmem %s1021_s16, 8192  ;;  %p1280_p4 = scmp.lt.s32.totalorder %s988_s5, %s1021_s16 }
  0x39   : > { %p624_p5 = scmp.lt.s32.totalorder %s1024_s17, %s618_s12 }
  0x3b   : > { %p625_p3 = por %p624_p5, %p1280_p4 }
  0x3d   : > { %p626_p6 = pnand %p625_p3, %p619_p12 }
  0x3f   : > { %629 = shalt.err (!%p626_p6)  }
  0x40   : > { %s1275_s18 = smov 128   ;;  %s1277_s23 = smov 1  }
  0x41   : > { %69 = dma.hbm_to_vmem [thread:$0]  %s64_s30, 32, %s988_s5, [#allocation2], %s1275_s18, %s1275_s18, %s1277_s23 }
  0x42   : > { %s73_s24 = scalar_select %p72_p13, %s991_s7, 0 }
  0x43   : > { %s92_s6 = scalar_select %p91_p1, %s997_s11, 0 }
  0x44   : > { %s1316_s24 = smov (!%p452_p0, %s73_s24), 511 }
  0x45   : > { %s1318_s6 = smov (!%p459_p2, %s92_s6), 511  ;;  %s76_s8 = sshrl.u32 %s1316_s24, 3 }
  0x46   : > { %s77_s10 = sand.u32 7, %s1316_s24   ;;  %s457_s3 = sshll.u32 %s76_s8, 4 }
  0x47   : > { %s95_s14 = sshrl.u32 %s1318_s6, 3  ;;  %s79_s12 = sadd.s32 %s457_s3, %s77_s10 }
  0x48   : > { %s96_s15 = sand.u32 7, %s1318_s6   ;;  %s458_s13 = sshll.u32 %s79_s12, 4 }
  0x49   : > { %s464_s25 = sshll.u32 %s95_s14, 4  ;;  %s81_s30 = scalar_lea.hbm %s1269_s1, %s458_s13 }
  0x4a   : > { %s98_s18 = sadd.s32 %s464_s25, %s96_s15  ;;  %s630_s23 = scalar_lea.hbm %s81_s30, 32 }
  0x4b   : > { %p631_p13 = scmp.ne.s32.totalorder %s81_s30, %s630_s23  ;;  %p633_p0 = scmp.lt.u32.totalorder %s81_s30, %s1269_s1 }
  0x4c   : > { %p634_p1 = scmp.lt.u32.totalorder %s1013_s28, %s630_s23  ;;  %p636_p8 = scmp.lt.u32.totalorder %s630_s23, %s81_s30 }
  0x4e   : > { %p635_p2 = por %p634_p1, %p633_p0 }
  0x50   : > { %p637_p10 = por %p636_p8, %p635_p2 }
  0x52   : > { %p638_p11 = pnand %p637_p10, %p631_p13 }
  0x54   : > { %641 = shalt.err (!%p638_p11)  }
  0x55   : > { %s642_s22 = scalar_lea.vmem %s995_s9, 32  ;;  %p647_p5 = scmp.lt.s32.totalorder %s995_s9, %s1021_s16 }
  0x56   : > { %p643_p12 = scmp.ne.s32.totalorder %s995_s9, %s642_s22  ;;  %p648_p3 = scmp.lt.s32.totalorder %s1024_s17, %s642_s22 }
  0x58   : > { %p649_p6 = por %p648_p3, %p647_p5 }
  0x5a   : > { %p650_p4 = pnand %p649_p6, %p643_p12 }
  0x5c   : > { %653 = shalt.err (!%p650_p4)  }
  0x5d   : > { %s1292_s19 = smov 1   ;;  %s1293_s25 = smov 128  }
  0x5e   : > { %88 = dma.hbm_to_vmem [thread:$0]  %s81_s30, 32, %s995_s9, [#allocation2 + $0x1], %s1293_s25, %s1293_s25, %s1292_s19 }
  0x5f   : > { %s465_s27 = sshll.u32 %s98_s18, 4  ;;  %s1294_s11 = sadd.s32 3, %s980_s29 }
  0x60   : > { %s1064_s13 = sld [smem:[#allocation4 + %s1294_s11]]  ;;  %s100_s6 = scalar_lea.hbm %s1269_s1, %s465_s27 }
  0x61   : > { %s120_s8 = scalar_lea.vmem %s985_s4, 3 [#allocation5]  ;;  %s654_s10 = scalar_lea.hbm %s100_s6, 32 }
  0x62   : > { %p655_p13 = scmp.ne.s32.totalorder %s100_s6, %s654_s10  ;;  %p657_p4 = scmp.lt.u32.totalorder %s100_s6, %s1269_s1 }
  0x63   : > { %p658_p0 = scmp.lt.u32.totalorder %s1013_s28, %s654_s10  ;;  %p660_p2 = scmp.lt.u32.totalorder %s654_s10, %s100_s6 }
  0x65   : > { %p659_p1 = por %p658_p0, %p657_p4 }
  0x67   : > { %p661_p8 = por %p660_p2, %p659_p1 }
  0x69   : > { %p662_p10 = pnand %p661_p8, %p655_p13 }
  0x6b   : > { %665 = shalt.err (!%p662_p10)  }
  0x6c   : > { %s666_s9 = scalar_lea.vmem %s1008_s0, 32  ;;  %p671_p12 = scmp.lt.s32.totalorder %s1008_s0, %s1021_s16 }
  0x6d   : > { %p667_p11 = scmp.ne.s32.totalorder %s1008_s0, %s666_s9  ;;  %p672_p5 = scmp.lt.s32.totalorder %s1024_s17, %s666_s9 }
  0x6f   : > { %p673_p3 = por %p672_p5, %p671_p12 }
  0x71   : > { %p674_p6 = pnand %p673_p3, %p667_p11 }
  0x73   : > { %677 = shalt.err (!%p674_p6)  }
  0x74   : > { %107 = dma.hbm_to_vmem [thread:$0]  %s100_s6, 32, %s1008_s0, [#allocation2 + $0x2], %s1293_s25, %s1293_s25, %s1292_s19 }
  0x75   : > { %s123_s18 = sshll.u32 %s120_s8, 4  ;;  %s127_s12 = sadd.s32 4, %s980_s29  ;;  %s1084_s18 = int_to_ptr.vmem [resolvable:$true] %s123_s18 }
  0x76   : > { %s1086_s15 = sld [smem:[#allocation4 + %s127_s12]]  ;;  %s139_s30 = scalar_lea.vmem %s985_s4, 4 [#allocation5] }
  0x77   : > { %s146_s7 = sadd.s32 5, %s980_s29  ;;  %p110_p13 = scmp.gt.s32.totalorder %s1064_s13, 0 }
  0x78   : > { %p466_p4 = scmp.lt.s32.totalorder %s1064_s13, 511  ;;  %s142_s22 = sshll.u32 %s139_s30, 4  ;;  %s1095_s22 = int_to_ptr.vmem [resolvable:$true] %s142_s22 }
  0x79   : > { %s1092_s27 = sld [smem:[#allocation4 + %s146_s7]]  ;;  %s1320_s13 = smov (!%p110_p13, %s1064_s13), 0 }
  0x7a   : > { %s158_s0 = scalar_lea.vmem %s985_s4, 5 [#allocation5]  ;;  %s1322_s13 = smov (!%p466_p4, %s1320_s13), 511 }
  0x7b   : > { %s114_s11 = sshrl.u32 %s1322_s13, 3  ;;  %s115_s23 = sand.u32 7, %s1322_s13  }
  0x7c   : > { %s471_s24 = sshll.u32 %s114_s11, 4  ;;  %s161_s10 = sshll.u32 %s158_s0, 4  ;;  %s1105_s10 = int_to_ptr.vmem [resolvable:$true] %s161_s10 }
  0x7d   : > { %s117_s6 = sadd.s32 %s471_s24, %s115_s23 }
  0x7e   : > { %s472_s8 = sshll.u32 %s117_s6, 4 }
  0x7f   : > { %s119_s9 = scalar_lea.hbm %s1269_s1, %s472_s8 }
  0x80   : > { %s678_s12 = scalar_lea.hbm %s119_s9, 32  ;;  %p681_p11 = scmp.lt.u32.totalorder %s119_s9, %s1269_s1 }
  0x81   : > { %p679_p10 = scmp.ne.s32.totalorder %s119_s9, %s678_s12  ;;  %p682_p12 = scmp.lt.u32.totalorder %s1013_s28, %s678_s12 }
  0x82   : > { %p684_p3 = scmp.lt.u32.totalorder %s678_s12, %s119_s9 }
  0x83   : > { %p683_p5 = por %p682_p12, %p681_p11 }
  0x85   : > { %p685_p6 = por %p684_p3, %p683_p5 }
  0x87   : > { %p686_p13 = pnand %p685_p6, %p679_p10 }
  0x89   : > { %689 = shalt.err (!%p686_p13)  }
  0x8a   : > { %s690_s13 = scalar_lea.vmem %s1084_s18, 32  ;;  %p695_p8 = scmp.lt.s32.totalorder %s1084_s18, %s1021_s16 }
  0x8b   : > { %p691_p4 = scmp.ne.s32.totalorder %s1084_s18, %s690_s13  ;;  %p696_p1 = scmp.lt.s32.totalorder %s1024_s17, %s690_s13 }
  0x8d   : > { %p697_p2 = por %p696_p1, %p695_p8 }
  0x8f   : > { %p698_p0 = pnand %p697_p2, %p691_p4 }
  0x91   : > { %701 = shalt.err (!%p698_p0)  }
  0x92   : > { %126 = dma.hbm_to_vmem [thread:$0]  %s119_s9, 32, %s1084_s18, [#allocation2 + $0x3], %s1293_s25, %s1293_s25, %s1292_s19 }
  0x93   : > { %p1295_p10 = scmp.gt.s32.totalorder %s1086_s15, 0  ;;  %p1296_p11 = scmp.gt.s32.totalorder %s1092_s27, 0 }
  0x94   : > { %p1297_p12 = scmp.lt.s32.totalorder %s1086_s15, 511  ;;  %p1298_p1 = scmp.lt.s32.totalorder %s1092_s27, 511 }
  0x95   : > { %s130_s0 = scalar_select %p1295_p10, %s1086_s15, 0 }
  0x96   : > { %s149_s11 = scalar_select %p1296_p11, %s1092_s27, 0 }
  0x97   : > { %s1324_s0 = smov (!%p1297_p12, %s130_s0), 511 }
  0x98   : > { %s1326_s11 = smov (!%p1298_p1, %s149_s11), 511  ;;  %s133_s23 = sshrl.u32 %s1324_s0, 3 }
  0x99   : > { %s134_s24 = sand.u32 7, %s1324_s0   ;;  %s478_s6 = sshll.u32 %s133_s23, 4 }
  0x9a   : > { %s152_s8 = sshrl.u32 %s1326_s11, 3  ;;  %s136_s3 = sadd.s32 %s478_s6, %s134_s24 }
  0x9b   : > { %s153_s14 = sand.u32 7, %s1326_s11   ;;  %s479_s12 = sshll.u32 %s136_s3, 4 }
  0x9c   : > { %s485_s30 = sshll.u32 %s152_s8, 4  ;;  %s138_s18 = scalar_lea.hbm %s1269_s1, %s479_s12 }
  0x9d   : > { %s155_s9 = sadd.s32 %s485_s30, %s153_s14  ;;  %s702_s2 = scalar_lea.hbm %s138_s18, 32 }
  0x9e   : > { %p703_p0 = scmp.ne.s32.totalorder %s138_s18, %s702_s2  ;;  %p705_p2 = scmp.lt.u32.totalorder %s138_s18, %s1269_s1 }
  0x9f   : > { %p706_p8 = scmp.lt.u32.totalorder %s1013_s28, %s702_s2  ;;  %p708_p3 = scmp.lt.u32.totalorder %s702_s2, %s138_s18 }
  0xa1   : > { %p707_p5 = por %p706_p8, %p705_p2 }
  0xa3   : > { %p709_p6 = por %p708_p3, %p707_p5 }
  0xa5   : > { %p710_p13 = pnand %p709_p6, %p703_p0 }
  0xa7   : > { %713 = shalt.err (!%p710_p13)  }
  0xa8   : > { %s714_s27 = scalar_lea.vmem %s1095_s22, 32  ;;  %p719_p10 = scmp.lt.s32.totalorder %s1095_s22, %s1021_s16 }
  0xa9   : > { %p715_p4 = scmp.ne.s32.totalorder %s1095_s22, %s714_s27  ;;  %p720_p11 = scmp.lt.s32.totalorder %s1024_s17, %s714_s27 }
  0xab   : > { %p721_p12 = por %p720_p11, %p719_p10 }
  0xad   : > { %p722_p1 = pnand %p721_p12, %p715_p4 }
  0xaf   : > { %725 = shalt.err (!%p722_p1)  }
  0xb0   : > { %145 = dma.hbm_to_vmem [thread:$0]  %s138_s18, 32, %s1095_s22, [#allocation2 + $0x4], %s1293_s25, %s1293_s25, %s1292_s19 }
  0xb1   : > { %s486_s2 = sshll.u32 %s155_s9, 4  ;;  %s165_s26 = sadd.s32 6, %s980_s29 }
  0xb2   : > { %s157_s23 = scalar_lea.hbm %s1269_s1, %s486_s2  ;;  %s166_s24 = sld [smem:[#allocation4 + %s165_s26]] }
  0xb3   : > { %s726_s6 = scalar_lea.hbm %s157_s23, 32  ;;  %p729_p2 = scmp.lt.u32.totalorder %s157_s23, %s1269_s1 }
  0xb4   : > { %p727_p0 = scmp.ne.s32.totalorder %s157_s23, %s726_s6  ;;  %p730_p8 = scmp.lt.u32.totalorder %s1013_s28, %s726_s6 }
  0xb5   : > { %p732_p3 = scmp.lt.u32.totalorder %s726_s6, %s157_s23 }
  0xb6   : > { %p731_p5 = por %p730_p8, %p729_p2 }
  0xb8   : > { %p733_p6 = por %p732_p3, %p731_p5 }
  0xba   : > { %p734_p13 = pnand %p733_p6, %p727_p0 }
  0xbc   : > { %737 = shalt.err (!%p734_p13)  }
  0xbd   : > { %s738_s22 = scalar_lea.vmem %s1105_s10, 32  ;;  %p743_p10 = scmp.lt.s32.totalorder %s1105_s10, %s1021_s16 }
  0xbe   : > { %p739_p4 = scmp.ne.s32.totalorder %s1105_s10, %s738_s22  ;;  %p744_p11 = scmp.lt.s32.totalorder %s1024_s17, %s738_s22 }
  0xc0   : > { %p745_p12 = por %p744_p11, %p743_p10 }
  0xc2   : > { %p746_p1 = pnand %p745_p12, %p739_p4 }
  0xc4   : > { %749 = shalt.err (!%p746_p1)  }
  0xc5   : > { %164 = dma.hbm_to_vmem [thread:$0]  %s157_s23, 32, %s1105_s10, [#allocation2 + $0x5], %s1293_s25, %s1293_s25, %s1292_s19 }
  0xc6   : > { %s184_s14 = sadd.s32 7, %s980_s29  ;;  %s177_s30 = scalar_lea.vmem %s985_s4, 6 [#allocation5] }
  0xc7   : > { %s1164_s12 = sld [smem:[#allocation4 + %s184_s14]]  ;;  %p167_p0 = scmp.gt.s32.totalorder %s166_s24, 0 }
  0xc8   : > { %p487_p2 = scmp.lt.s32.totalorder %s166_s24, 511  ;;  %s180_s7 = sshll.u32 %s177_s30, 4  ;;  %s181_s7 = int_to_ptr.vmem [resolvable:$true] %s180_s7 }
  0xc9   : > { %s1328_s24 = smov (!%p167_p0, %s166_s24), 0  ;;  %s196_s11 = scalar_lea.vmem %s985_s4, 7 [#allocation5] }
  0xca   : > { %s1330_s24 = smov (!%p487_p2, %s1328_s24), 511 }
  0xcb   : > { %s171_s18 = sshrl.u32 %s1330_s24, 3  ;;  %s172_s9 = sand.u32 7, %s1330_s24  }
  0xcc   : > { %s492_s10 = sshll.u32 %s171_s18, 4 }
  0xcd   : > { %p186_p8 = scmp.gt.s32.totalorder %s1164_s12, 0  ;;  %s174_s15 = sadd.s32 %s492_s10, %s172_s9 }
  0xce   : > { %s493_s27 = sshll.u32 %s174_s15, 4 }
  0xcf   : > { %s1169_s13 = scalar_select %p186_p8, %s1164_s12, 0 }
  0xd0   : > { %s176_s0 = scalar_lea.hbm %s1269_s1, %s493_s27 }
  0xd1   : > { %s750_s23 = scalar_lea.hbm %s176_s0, 32  ;;  %p753_p6 = scmp.lt.u32.totalorder %s176_s0, %s1269_s1 }
  0xd2   : > { %p751_p3 = scmp.ne.s32.totalorder %s176_s0, %s750_s23  ;;  %p754_p13 = scmp.lt.u32.totalorder %s1013_s28, %s750_s23 }
  0xd3   : > { %p756_p10 = scmp.lt.u32.totalorder %s750_s23, %s176_s0 }
  0xd4   : > { %p755_p4 = por %p754_p13, %p753_p6 }
  0xd6   : > { %p757_p11 = por %p756_p10, %p755_p4 }
  0xd8   : > { %p758_p12 = pnand %p757_p11, %p751_p3 }
  0xda   : > { %761 = shalt.err (!%p758_p12)  }
  0xdb   : > { %s762_s24 = scalar_lea.vmem %s181_s7, 32  ;;  %p767_p0 = scmp.lt.s32.totalorder %s181_s7, %s1021_s16 }
  0xdc   : > { %p763_p1 = scmp.ne.s32.totalorder %s181_s7, %s762_s24  ;;  %p768_p2 = scmp.lt.s32.totalorder %s1024_s17, %s762_s24 }
  0xde   : > { %p769_p8 = por %p768_p2, %p767_p0 }
  0xe0   : > { %p770_p5 = pnand %p769_p8, %p763_p1 }
  0xe2   : > { %773 = shalt.err (!%p770_p5)  }
  0xe3   : > { %183 = dma.hbm_to_vmem [thread:$0]  %s176_s0, 32, %s181_s7, [#allocation2 + $0x6], %s1293_s25, %s1293_s25, %s1292_s19 }
  0xe4   : > { %p1299_p6 = scmp.lt.s32.totalorder %s1164_s12, 511  ;;  %s199_s3 = sshll.u32 %s196_s11, 4  ;;  %s200_s3 = int_to_ptr.vmem [resolvable:$true] %s199_s3 }
  0xe6   : > { %s1332_s13 = smov (!%p1299_p6, %s1169_s13), 511 }
  0xe7   : > { %s190_s22 = sshrl.u32 %s1332_s13, 3  ;;  %s191_s14 = sand.u32 7, %s1332_s13  }
  0xe8   : > { %s499_s30 = sshll.u32 %s190_s22, 4 }
  0xe9   : > { %s193_s18 = sadd.s32 %s499_s30, %s191_s14 }
  0xea   : > { %s500_s9 = sshll.u32 %s193_s18, 4 }
  0xeb   : > { %s195_s27 = scalar_lea.hbm %s1269_s1, %s500_s9 }
  0xec   : > { %s774_s2 = scalar_lea.hbm %s195_s27, 32  ;;  %p777_p3 = scmp.lt.u32.totalorder %s195_s27, %s1269_s1 }
  0xed   : > { %p775_p5 = scmp.ne.s32.totalorder %s195_s27, %s774_s2  ;;  %p778_p13 = scmp.lt.u32.totalorder %s1013_s28, %s774_s2 }
  0xee   : > { %p780_p10 = scmp.lt.u32.totalorder %s774_s2, %s195_s27 }
  0xef   : > { %p779_p4 = por %p778_p13, %p777_p3 }
  0xf1   : > { %p781_p11 = por %p780_p10, %p779_p4 }
  0xf3   : > { %p782_p12 = pnand %p781_p11, %p775_p5 }
  0xf5   : > { %785 = shalt.err (!%p782_p12)  }
  0xf6   : > { %s786_s12 = scalar_lea.vmem %s200_s3, 32  ;;  %p791_p0 = scmp.lt.s32.totalorder %s200_s3, %s1021_s16 }
  0xf7   : > { %p787_p1 = scmp.ne.s32.totalorder %s200_s3, %s786_s12  ;;  %p792_p2 = scmp.lt.s32.totalorder %s1024_s17, %s786_s12 }
  0xf9   : > { %p793_p8 = por %p792_p2, %p791_p0 }
  0xfb   : > { %p794_p6 = pnand %p793_p8, %p787_p1 }
  0xfd   : > { %797 = shalt.err (!%p794_p6)  }
  0xfe   : > { %202 = dma.hbm_to_vmem [thread:$0]  %s195_s27, 32, %s200_s3, [#allocation2 + $0x7], %s1293_s25, %s1293_s25, %s1292_s19 }
  0xff   : > { %s1200_s7 = smov 8  }
 0x100 LB: >> { %s501_s13 = sadd.s32 4294967288, %s904_s7  ;;  %s904_s7 = sphi %s1200_s7, %s208_s7  }
 0x101   : >> { %p210_p5 = scmp.lt.s32.totalorder %s501_s13, 0  ;;  %s211_s0 = ssub.s32 0, %s501_s13 }
 0x102   : >> { %s502_s11 = smin.u32 %s501_s13, %s211_s0 }
 0x103   : >> { %s213_s6 = sand.u32 7, %s502_s11  }
 0x104   : >> { %s214_s8 = ssub.s32 0, %s213_s6 }
 0x105   : >> { %s1334_s8 = smov (!%p210_p5, %s214_s8), %s213_s6 }
 0x106   : >> { %p504_p3 = scmp.lt.s32.totalorder %s1334_s8, 0  ;;  %s220_s24 = sadd.s32 8, %s1334_s8 }
 0x108   : >> { %s1336_s24 = smov (!%p504_p3, %s220_s24), %s1334_s8 }
 0x109   : >> { %s222_s22 = scalar_lea.sflag [#allocation2], %s1336_s24 }
 0x10a   : >> { %868 = dma.done.wait %s222_s22, 32 }
 0x10b   : >> { %869 = vsyncadd %s222_s22, 4294967264  ;;  %s226_s19 = sadd.s32 %s904_s7, %s980_s29  ;;  %p232_p13 = scmp.lt.s32.totalorder %s904_s7, 0 }
 0x10c   : >> { %s227_s25 = sld [smem:[#allocation4 + %s226_s19]]  ;;  %s233_s3 = ssub.s32 0, %s904_s7 }
 0x10d   : >> { %s510_s14 = smin.u32 %s904_s7, %s233_s3  ;;  %s250_s30 = sshrl.u32 %s904_s7, 3 }
 0x10e   : >> { %s235_s18 = sand.u32 7, %s510_s14   ;;  %s251_s9 = sand.u32 7, %s904_s7  }
 0x10f   : >> { %s236_s10 = ssub.s32 0, %s235_s18  ;;  %s515_s15 = sshll.u32 %s250_s30, 4 }
 0x110   : >> { %s1338_s10 = smov (!%p232_p13, %s236_s10), %s235_s18  ;;  %s253_s27 = sadd.s32 %s515_s15, %s251_s9 }
 0x111   : >> { %p512_p11 = scmp.lt.s32.totalorder %s1338_s10, 0  ;;  %s242_s2 = sadd.s32 8, %s1338_s10 }
 0x112   : >> { %p228_p4 = scmp.gt.s32.totalorder %s227_s25, 0  ;;  %p505_p10 = scmp.lt.s32.totalorder %s227_s25, 511 }
 0x113   : >> { %s1342_s2 = smov (!%p512_p11, %s242_s2), %s1338_s10  ;;  %s254_s26 = scalar_lea.vmem %s985_s4, %s253_s27 [#allocation5] }
 0x114   : >> { %s1340_s25 = smov (!%p228_p4, %s227_s25), 0  ;;  %s257_s0 = sshll.u32 %s254_s26, 4  ;;  %s258_s0 = int_to_ptr.vmem [resolvable:$true] %s257_s0 }
 0x115   : >> { %s1344_s25 = smov (!%p505_p10, %s1340_s25), 511  ;;  %s255_s19 = scalar_lea.sflag [#allocation2], %s1342_s2 }
 0x116   : >> { %s244_s23 = sshrl.u32 %s1344_s25, 3  ;;  %s245_s12 = sand.u32 7, %s1344_s25  }
 0x117   : >> { %s513_s13 = sshll.u32 %s244_s23, 4 }
 0x118   : >> { %s247_s11 = sadd.s32 %s513_s13, %s245_s12 }
 0x119   : >> { %s514_s6 = sshll.u32 %s247_s11, 4 }
 0x11a   : >> { %s249_s22 = scalar_lea.hbm %s1269_s1, %s514_s6 }
 0x11b   : >> { %s798_s3 = scalar_lea.hbm %s249_s22, 32  ;;  %p801_p1 = scmp.lt.u32.totalorder %s249_s22, %s1269_s1 }
 0x11c   : >> { %p799_p12 = scmp.ne.s32.totalorder %s249_s22, %s798_s3  ;;  %p802_p0 = scmp.lt.u32.totalorder %s1013_s28, %s798_s3 }
 0x11d   : >> { %p804_p8 = scmp.lt.u32.totalorder %s798_s3, %s249_s22 }
 0x11e   : >> { %p803_p2 = por %p802_p0, %p801_p1 }
 0x120   : >> { %p805_p6 = por %p804_p8, %p803_p2 }
 0x122   : >> { %p806_p5 = pnand %p805_p6, %p799_p12 }
 0x124   : >> { %809 = shalt.err (!%p806_p5)  }
 0x125   : >> { %s810_s25 = scalar_lea.vmem %s258_s0, 32  ;;  %p815_p13 = scmp.lt.s32.totalorder %s258_s0, %s1021_s16 }
 0x126   : >> { %p811_p3 = scmp.ne.s32.totalorder %s258_s0, %s810_s25  ;;  %p816_p4 = scmp.lt.s32.totalorder %s1024_s17, %s810_s25 }
 0x128   : >> { %p817_p10 = por %p816_p4, %p815_p13 }
 0x12a   : >> { %p818_p11 = pnand %p817_p10, %p811_p3 }
 0x12c   : >> { %821 = shalt.err (!%p818_p11)  }
 0x12d   : >> { %s910_s18 = smov 128   ;;  %s911_s9 = smov 1  }
 0x12e   : >> { %260 = dma.hbm_to_vmem [thread:$0]  %s249_s22, 32, %s258_s0, %s255_s19, %s910_s18, %s910_s18, %s911_s9 }
 0x12f   : >> { %s208_s7 = sadd.s32 1, %s904_s7  }
 0x130   : >> { %p205_p9 = scmp.ge.s32.totalorder %s208_s7, 128  }
 0x132   : > { %207 = sbr.rel (!%p205_p9) target bundleno = 256 (0x100), region = 84 }
 0x139   : > { %870 = dma.done.wait [#allocation2], 32 }
 0x13a   : > { %871 = vsyncadd [#allocation2], 4294967264 }
 0x13b   : > { %872 = dma.done.wait [#allocation2 + $0x1], 32 }
 0x13c   : > { %873 = vsyncadd [#allocation2 + $0x1], 4294967264 }
 0x13d   : > { %874 = dma.done.wait [#allocation2 + $0x2], 32 }
 0x13e   : > { %875 = vsyncadd [#allocation2 + $0x2], 4294967264 }
 0x13f   : > { %876 = dma.done.wait [#allocation2 + $0x3], 32 }
 0x140   : > { %877 = vsyncadd [#allocation2 + $0x3], 4294967264 }
 0x141   : > { %878 = dma.done.wait [#allocation2 + $0x4], 32 }
 0x142   : > { %879 = vsyncadd [#allocation2 + $0x4], 4294967264 }
 0x143   : > { %880 = dma.done.wait [#allocation2 + $0x5], 32 }
 0x144   : > { %881 = vsyncadd [#allocation2 + $0x5], 4294967264 }
 0x145   : > { %882 = dma.done.wait [#allocation2 + $0x6], 32 }
 0x146   : > { %883 = vsyncadd [#allocation2 + $0x6], 4294967264 }
 0x147   : > { %884 = dma.done.wait [#allocation2 + $0x7], 32 }
 0x148   : > { %885 = vsyncadd [#allocation2 + $0x7], 4294967264  ;;  %s549_s29 = sshll.u32 %s900_s21, 12  ;;  %s1301_s10 = sld [smem:[#allocation32_spill]] }
 0x149   : > { %s1302_s27 = sand.u32 1, %s896_s20   ;;  %s822_s26 = scalar_lea.vmem %s988_s5, 4096 }
 0x14a   : > { %s279_s2 = scalar_lea.sflag [#allocation6], %s1302_s27  ;;  %p823_p9 = scmp.ne.s32.totalorder %s988_s5, %s822_s26 }
 0x14b   : > { %p830_p0 = scmp.lt.s32.totalorder %s1024_s17, %s822_s26  ;;  %p1303_p2 = scmp.lt.s32.totalorder %s988_s5, %s1021_s16 }
 0x14c   : > { %p824_p12 = pnand %p823_p9, %p969_p7 }
 0x14d   : > { %p831_p8 = por %p830_p0, %p1303_p2 }
 0x14e   : > { %s292_s15 = scalar_lea.hbm %s1301_s10, %s549_s29  ;;  %p825_p1 = pneg %p824_p12 }
 0x150   : > { %p832_p6 = pnand %p831_p8, %p825_p1 }
 0x152   : > { %835 = shalt.err (!%p832_p6)
}
 0x153   : > { %s836_s23 = scalar_lea.hbm %s292_s15, 4096  ;;  %s840_s0 = scalar_lea.hbm %s1301_s10, 8192 }
 0x154   : > { %p837_p5 = scmp.ne.s32.totalorder %s292_s15, %s836_s23  ;;  %p841_p4 = scmp.lt.u32.totalorder %s292_s15, %s1301_s10 }
 0x155   : > { %p842_p10 = scmp.lt.u32.totalorder %s840_s0, %s836_s23  ;;  %p844_p9 = scmp.lt.u32.totalorder %s836_s23, %s292_s15 }
 0x156   : > { %p838_p3 = pnand %p837_p5, %p969_p7 }
 0x157   : > { %p843_p11 = por %p842_p10, %p841_p4 }
 0x158   : > { %p839_p13 = pneg %p838_p3 }
 0x159   : > { %p845_p12 = por %p844_p9, %p843_p11 }
 0x15b   : > { %p846_p1 = pnand %p845_p12, %p839_p13 }
 0x15d   : > { %849 = shalt.err (!%p846_p1)
}
 0x15e   : > { %s912_s16 = smov 256   ;;  %s913_s17 = smov 16  }
 0x15f   : > { %550 = dma.vmem_to_hbm [thread:$0]  (%p969_p7), %s988_s5, 4096, %s292_s15, %s279_s2, %s912_s16, %s912_s16, %s913_s17  }
 0x160 PF: > { %s1304_s8 = sld [smem:[#allocation27_spill]]  ;;  %s1305_s24 = sld [smem:[#allocation31_spill]] }
 0x161   : > { %p556_p0 = scmp.ge.s32.totalorder %s900_s21, 1 }
 0x166   : > { %s308_s22 = sand.u32 1, %s1304_s8   ;;  %p1306_p2 = scmp.ne.s32.totalorder %s1305_s24, 0 }
 0x167   : > { %s309_s19 = scalar_lea.sflag [#allocation6], %s308_s22 }
 0x168   : > { %p553_p8 = pnand %p556_p0, %p1306_p2 }
 0x16a   : > { %887 = dma.done.wait (!%p553_p8), %s309_s19, 4096  }
 0x16b   : > { %889 = vsyncadd (!%p553_p8), %s309_s19, 4294963200  ;;  %s1307_s21 = sld [smem:[#allocation28_spill]]  ;;  %s1308_s3 = sld [smem:[#allocation29_spill]] }
 0x16c   : > { %s1309_s19 = smov %s896_s20 }
 0x171   : > { %p16_p6 = scmp.ge.s32.totalorder %s1307_s21, 3   ;;  %s1310_s20 = smov %s1308_s3 }
 0x173   :  { %18 = sbr.rel (!%p16_p6) target bundleno = 15 (0xf), region = 95 }
 0x17a   :  { %314 = vsyncpa [#allocation6], 1 }
 0x17b   :  { %316 = vsyncpa [#allocation6 + $0x1], 1 }
 0x17c   :  { %317 = vsyncmov [#allocation2] }
 0x17f   :  { %s318_s5 = vpop.sfrf %317 }
 0x180   :  { %p522_p7 = scmp.ne.s32.totalorder %s318_s5, 0 }
 0x182   :  { %322 = shalt.err (%p522_p7)  }
 0x183   :  { %324 = vsyncmov [#allocation2 + $0x1] }
 0x186   :  { %s325_s14 = vpop.sfrf %324 }
 0x187   :  { %p523_p5 = scmp.ne.s32.totalorder %s325_s14, 0 }
 0x189   :  { %329 = shalt.err (%p523_p5)  }
 0x18a   :  { %331 = vsyncmov [#allocation2 + $0x2] }
 0x18d   :  { %s332_s30 = vpop.sfrf %331 }
 0x18e   :  { %p524_p3 = scmp.ne.s32.totalorder %s332_s30, 0 }
 0x190   :  { %336 = shalt.err (%p524_p3)  }
 0x191   :  { %338 = vsyncmov [#allocation2 + $0x3] }
 0x194   :  { %s339_s25 = vpop.sfrf %338 }
 0x195   :  { %p525_p13 = scmp.ne.s32.totalorder %s339_s25, 0 }
 0x197   :  { %343 = shalt.err (%p525_p13)  }
 0x198   :  { %345 = vsyncmov [#allocation2 + $0x4] }
 0x19b   :  { %s346_s21 = vpop.sfrf %345 }
 0x19c   :  { %p526_p4 = scmp.ne.s32.totalorder %s346_s21, 0 }
 0x19e   :  { %350 = shalt.err (%p526_p4)  }
 0x19f   :  { %352 = vsyncmov [#allocation2 + $0x5] }
 0x1a2   :  { %s353_s1 = vpop.sfrf %352 }
 0x1a3   :  { %p527_p10 = scmp.ne.s32.totalorder %s353_s1, 0 }
 0x1a5   :  { %357 = shalt.err (%p527_p10)  }
 0x1a6   :  { %359 = vsyncmov [#allocation2 + $0x6] }
 0x1a9   :  { %s360_s20 = vpop.sfrf %359 }
 0x1aa   :  { %p528_p11 = scmp.ne.s32.totalorder %s360_s20, 0 }
 0x1ac   :  { %364 = shalt.err (%p528_p11)  }
 0x1ad   :  { %366 = vsyncmov [#allocation2 + $0x7] }
 0x1b0   :  { %s367_s18 = vpop.sfrf %366 }
 0x1b1   :  { %p529_p9 = scmp.ne.s32.totalorder %s367_s18, 0 }
 0x1b3   :  { %371 = shalt.err (%p529_p9)  }

</bundles_post_ra>
